<compile_context>
chip_gen: v7x
topology: tpu7x:2x2x1
jax: 0.10.0
libtpu: 0.0.40
codegen_flags: <defaults>
</compile_context>

<pallas_src>
import functools

import jax
import jax.numpy as jnp
from jax.experimental import pallas as pl
from jax.experimental.pallas import tpu as pltpu

_LANE = 128


def _cdiv(a, b):
    return -(-a // b)


def _round_up(x, m):
    return _cdiv(x, m) * m


def _vmem_limit_bytes():
    """Generation-aware scoped VMEM limit (<=48 MiB on v7x, <=96 MiB elsewhere)."""
    cap = 64 * 1024 * 1024  # conservative default == v7x physical VMEM
    try:
        cap = int(pltpu.get_tpu_info().vmem_capacity_bytes)
    except Exception:
        pass
    return min(cap * 3 // 4, 96 * 1024 * 1024)


def _pick_tb(n, c, itemsize):
    """Batch rows folded into the sublane dim so TB*C fills sublane packs."""
    pack = 32 // itemsize          # 8 for f32, 16 for bf16, 32 for int8/fp8
    if c % pack == 0:
        return 1                   # channels already fill sublanes
    for tb in range(1, n + 1):     # smallest divisor of N with full packing
        if n % tb == 0 and (tb * c) % pack == 0:
            return tb
    best = 1                       # otherwise: best partial fill
    for tb in range(1, n + 1):
        if n % tb == 0 and tb * c <= pack:
            best = tb
    return best


# ---------------------------------------------------------------------------
# Kernels
# ---------------------------------------------------------------------------
def _apply_noise_kernel(w_ref, x_ref, n_ref, o_ref, *, tb, c):
    """x_ref/o_ref: (1, tb*c, TH) VMEM; n_ref: (1, tb, TH) VMEM; w_ref: (1,) SMEM."""
    w = w_ref[0]  # float32 scalar
    if tb == 1 or c == 1:
        x = x_ref[...].astype(jnp.float32)
        n = n_ref[...].astype(jnp.float32)      # broadcasts over the channel rows
        o_ref[...] = (x + w * n).astype(o_ref.dtype)
    else:
        # One noise row per batch row in the group, sublane-broadcast over its
        # c channel rows.  Static slices, tiny unrolled loop (VPU has slack).
        for b in range(tb):
            x = x_ref[:, b * c:(b + 1) * c, :].astype(jnp.float32)
            n = n_ref[:, b:b + 1, :].astype(jnp.float32)
            o_ref[:, b * c:(b + 1) * c, :] = (x + w * n).astype(o_ref.dtype)


def _apply_noise_prng_kernel(w_ref, seed_ref, x_ref, o_ref, *, tb, c):
    """noise=None path: generate N(0,1) noise in-kernel, one row per batch row."""
    step = pl.program_id(0) * pl.num_programs(1) + pl.program_id(1)
    pltpu.prng_seed(seed_ref[0] + step)         # independent noise per tile
    th = x_ref.shape[-1]
    n = pltpu.stateful_normal((tb, th), jnp.float32)
    w = w_ref[0]
    if tb == 1 or c == 1:
        o_ref[...] = (x_ref[...].astype(jnp.float32) + w * n).astype(o_ref.dtype)
    else:
        for b in range(tb):
            x = x_ref[:, b * c:(b + 1) * c, :].astype(jnp.float32)
            o_ref[:, b * c:(b + 1) * c, :] = (x + w * n[b:b + 1, :]).astype(o_ref.dtype)


# ---------------------------------------------------------------------------
# Wrapper
# ---------------------------------------------------------------------------
def _apply_noise_pallas(x, weight, noise, seed):
    N, C, H, W = x.shape
    HW = H * W
    dtype = x.dtype
    itemsize = jnp.dtype(dtype).itemsize

    TB = _pick_tb(N, C, itemsize)
    G = N // TB
    TBC = TB * C

    # Free, contiguous reshapes: fold TB batches into the sublane dim.
    x_flat = x.reshape(G, TBC, HW)
    n_flat = None
    if noise is not None:
        assert noise.shape == (N, 1, H, W), "noise must be (N, 1, H, W)"
        n_flat = noise.reshape(G, TB, HW)

    vmem_limit = _vmem_limit_bytes()
    payload_target = min(8 * 1024 * 1024, vmem_limit // 6)

    # Lane-dense tile width.  No padding: ragged edge blocks are clipped by
    # Pallas (block_shape only has to satisfy the (8,128)/full-dim rule).
    if HW <= _LANE:
        TH = HW
    else:
        th = payload_target // max(1, TB * (2 * C + 1) * itemsize)
        TH = max(_LANE, (th // _LANE) * _LANE)
        TH = min(TH, _round_up(HW, _LANE))
        # Megacore (v7x has 2 TCs): keep at least 2 grid steps when possible.
        if G == 1 and _cdiv(HW, TH) == 1 and HW >= 2 * _LANE:
            TH = max(_LANE, _round_up(_cdiv(HW, 2), _LANE))

    grid = (G, _cdiv(HW, TH))

    w = jnp.asarray(weight, dtype=jnp.float32).reshape(-1)[:1]

    x_spec = pl.BlockSpec((1, TBC, TH), lambda g, t: (g, 0, t))
    out_spec = pl.BlockSpec((1, TBC, TH), lambda g, t: (g, 0, t))
    smem_spec = pl.BlockSpec(memory_space=pltpu.MemorySpace.SMEM)

    flops = 2 * N * C * HW
    bytes_x = N * C * HW * itemsize
    compiler_params = pltpu.CompilerParams(
        dimension_semantics=("parallel", "parallel"),
        vmem_limit_bytes=vmem_limit,
    )

    if noise is None:
        kern = functools.partial(_apply_noise_prng_kernel, tb=TB, c=C)
        cost = pl.CostEstimate(flops=flops, transcendentals=N * HW,
                               bytes_accessed=2 * bytes_x)
        out_flat = pl.pallas_call(
            kern,
            out_shape=jax.ShapeDtypeStruct((G, TBC, HW), dtype),
            grid=grid,
            in_specs=[smem_spec, smem_spec, x_spec],
            out_specs=out_spec,
            compiler_params=compiler_params,
            cost_estimate=cost,
        )(w, seed, x_flat)
    else:
        kern = functools.partial(_apply_noise_kernel, tb=TB, c=C)
        cost = pl.CostEstimate(flops=flops, transcendentals=0,
                               bytes_accessed=2 * bytes_x + N * HW * itemsize)
        n_spec = pl.BlockSpec((1, TB, TH), lambda g, t: (g, 0, t))
        out_flat = pl.pallas_call(
            kern,
            out_shape=jax.ShapeDtypeStruct((G, TBC, HW), dtype),
            grid=grid,
            in_specs=[smem_spec, x_spec, n_spec],
            out_specs=out_spec,
            compiler_params=compiler_params,
            cost_estimate=cost,
        )(w, x_flat, n_flat)

    return out_flat.reshape(N, C, H, W)


def apply_noise(x, weight, noise=None, *, key=None):
    """x: (N, C, H, W). weight: scalar / (1,). noise: (N, 1, H, W) or None."""
    if noise is None:
        # TODO(synk): key=None reuses a fixed seed (0); thread a real RNG key
        # (or a fresh seed) for training so repeated calls get fresh noise.
        if key is None:
            seed = jnp.zeros((1,), dtype=jnp.int32)
        else:
            seed = jax.random.randint(key, (1,), 0, 2**31 - 1, dtype=jnp.int32)
        try:
            return _apply_noise_pallas(x, weight, noise=None, seed=seed)
        except Exception:
            # Fallback: materialize noise in HBM and use the explicit-noise
            # kernel (only hit if the in-kernel PRNG path fails to lower).
            if key is None:
                key = jax.random.PRNGKey(0)
            noise = jax.random.normal(
                key, (x.shape[0], 1) + x.shape[2:], dtype=x.dtype)
    return _apply_noise_pallas(x, weight, noise=noise, seed=None)


if __name__ == "__main__":
    key = jax.random.PRNGKey(0)
    kx, kn, kx2, kn2, kseed = jax.random.split(key, 5)

    # Module-default-ish small shapes.
    N, C, H, W = 2, 4, 16, 16
    x = jax.random.normal(kx, (N, C, H, W), dtype=jnp.float32)
    noise = jax.random.normal(kn, (N, 1, H, W), dtype=jnp.float32)

    weight_zero = jnp.zeros((1,), dtype=jnp.float32)   # nn.Parameter(zeros(1))
    weight_nz = jnp.array([0.5], dtype=jnp.float32)

    # Case 1: weight = 0 -> identity.
    out0 = jax.block_until_ready(apply_noise(x, weight_zero, noise))
    assert jnp.allclose(out0, x, atol=1e-6), "weight=0 case mismatch"

    # Case 2: nonzero weight, explicit noise (broadcast over channels).
    out1 = jax.block_until_ready(apply_noise(x, weight_nz, noise))
    ref1 = x + weight_nz[0] * noise
    assert jnp.allclose(out1, ref1, atol=1e-6), "weight!=0 case mismatch"

    # Case 3: noise=None -> in-kernel PRNG noise.  weight=0 is still identity.
    out2 = jax.block_until_ready(apply_noise(x, weight_zero, noise=None, key=kseed))
    assert out2.shape == x.shape
    assert jnp.allclose(out2, x, atol=1e-6), "noise=None, weight=0 mismatch"
    out3 = jax.block_until_ready(apply_noise(x, weight_nz, noise=None, key=kseed))
    assert out3.shape == x.shape and bool(jnp.all(jnp.isfinite(out3)))

    # Case 4: ragged spatial dim (7x7 = 49 lanes) and odd channel count.
    N2, C2, H2, W2 = 2, 3, 7, 7
    x2 = jax.random.normal(kx2, (N2, C2, H2, W2), dtype=jnp.float32)
    n2 = jax.random.normal(kn2, (N2, 1, H2, W2), dtype=jnp.float32)
    out4 = jax.block_until_ready(apply_noise(x2, weight_nz, n2))
    ref4 = x2 + weight_nz[0] * n2
    assert jnp.allclose(out4, ref4, atol=1e-6), "ragged-HW case mismatch"

    # Case 5: bf16 end-to-end (f32 math in-kernel).
    xb = x.astype(jnp.bfloat16)
    nb = noise.astype(jnp.bfloat16)
    outb = jax.block_until_ready(apply_noise(xb, weight_nz, nb))
    refb = xb.astype(jnp.float32) + weight_nz[0] * nb.astype(jnp.float32)
    assert outb.dtype == jnp.bfloat16
    assert jnp.allclose(outb.astype(jnp.float32), refb, atol=5e-2), "bf16 mismatch"

    print("KERNEL_OK")
</pallas_src>

<mosaic_0001>
module attributes {stable_mosaic.version = 11 : i64} {
  func.func @_apply_noise_kernel(%arg0: i32, %arg1: i32, %arg2: memref<1xf32, #tpu.memory_space<smem>>, %arg3: memref<1x8x128xf32, #tpu.memory_space<vmem>>, %arg4: memref<1x2x128xf32, #tpu.memory_space<vmem>>, %arg5: memref<1x8x128xf32, #tpu.memory_space<vmem>>) attributes {dimension_semantics = [#tpu.dimension_semantics<parallel>, #tpu.dimension_semantics<parallel>], iteration_bounds = array<i64: 1, 2>, scalar_prefetch = 0 : i64, scratch_operands = 0 : i64, tpu.core_type = #tpu.core_type<tc>, window_params = [{transform_indices = @transform_0, window_bounds = array<i64: 1>}, {transform_indices = @transform_1, window_bounds = array<i64: 1, 8, 128>}, {transform_indices = @transform_2, window_bounds = array<i64: 1, 2, 128>}, {transform_indices = @transform_3, window_bounds = array<i64: 1, 8, 128>}]} {
    %c0 = arith.constant 0 : index
    %0 = memref.load %arg2[%c0] : memref<1xf32, #tpu.memory_space<smem>>
    %c0_0 = arith.constant 0 : index
    %c0_1 = arith.constant 0 : index
    %c0_2 = arith.constant 0 : index
    %1 = vector.load %arg3[%c0_0, %c0_1, %c0_2] : memref<1x8x128xf32, #tpu.memory_space<vmem>>, vector<1x4x128xf32>
    %c0_3 = arith.constant 0 : index
    %c0_4 = arith.constant 0 : index
    %c0_5 = arith.constant 0 : index
    %2 = vector.load %arg4[%c0_3, %c0_4, %c0_5] : memref<1x2x128xf32, #tpu.memory_space<vmem>>, vector<1x1x128xf32>
    %3 = vector.broadcast %0 : f32 to vector<1x1x128xf32>
    %4 = arith.mulf %3, %2 : vector<1x1x128xf32>
    %5 = vector.broadcast %4 : vector<1x1x128xf32> to vector<1x4x128xf32>
    %6 = arith.addf %1, %5 : vector<1x4x128xf32>
    %c0_6 = arith.constant 0 : index
    %c0_7 = arith.constant 0 : index
    %c0_8 = arith.constant 0 : index
    %7 = vector.load %arg5[%c0_6, %c0_7, %c0_8] : memref<1x8x128xf32, #tpu.memory_space<vmem>>, vector<1x4x128xf32>
    tpu.vector_store %arg5[%c0_6, %c0_7, %c0_8], %6 {strides = array<i32>} : memref<1x8x128xf32, #tpu.memory_space<vmem>>, vector<1x4x128xf32>,
    %c0_9 = arith.constant 0 : index
    %c4 = arith.constant 4 : index
    %c0_10 = arith.constant 0 : index
    %8 = vector.load %arg3[%c0_9, %c4, %c0_10] : memref<1x8x128xf32, #tpu.memory_space<vmem>>, vector<1x4x128xf32>
    %c0_11 = arith.constant 0 : index
    %c1 = arith.constant 1 : index
    %c0_12 = arith.constant 0 : index
    %9 = vector.load %arg4[%c0_11, %c1, %c0_12] : memref<1x2x128xf32, #tpu.memory_space<vmem>>, vector<1x1x128xf32>
    %10 = vector.broadcast %0 : f32 to vector<1x1x128xf32>
    %11 = arith.mulf %10, %9 : vector<1x1x128xf32>
    %12 = vector.broadcast %11 : vector<1x1x128xf32> to vector<1x4x128xf32>
    %13 = arith.addf %8, %12 : vector<1x4x128xf32>
    %c0_13 = arith.constant 0 : index
    %c4_14 = arith.constant 4 : index
    %c0_15 = arith.constant 0 : index
    %14 = vector.load %arg5[%c0_13, %c4_14, %c0_15] : memref<1x8x128xf32, #tpu.memory_space<vmem>>, vector<1x4x128xf32>
    tpu.vector_store %arg5[%c0_13, %c4_14, %c0_15], %13 {strides = array<i32>} : memref<1x8x128xf32, #tpu.memory_space<vmem>>, vector<1x4x128xf32>,
    return
  }
  func.func @transform_0(%arg0: i32, %arg1: i32) -> i32 {
    %c0_i32 = arith.constant 0 : i32
    %c0_i32_0 = arith.constant 0 : i32
    return %c0_i32 : i32
  }
  func.func @transform_1(%arg0: i32, %arg1: i32) -> (i32, i32, i32) {
    %c0_i32 = arith.constant 0 : i32
    %c0_i32_0 = arith.constant 0 : i32
    return %arg0, %c0_i32, %arg1 : i32, i32, i32
  }
  func.func @transform_2(%arg0: i32, %arg1: i32) -> (i32, i32, i32) {
    %c0_i32 = arith.constant 0 : i32
    %c0_i32_0 = arith.constant 0 : i32
    return %arg0, %c0_i32, %arg1 : i32, i32, i32
  }
  func.func @transform_3(%arg0: i32, %arg1: i32) -> (i32, i32, i32) {
    %c0_i32 = arith.constant 0 : i32
    %c0_i32_0 = arith.constant 0 : i32
    return %arg0, %c0_i32, %arg1 : i32, i32, i32
  }
}

</mosaic_0001>

<bundles_post_ra>
// kernel: tpu_custom_call.1
= control target key start
LH: loop header
LB: loop body
LE: loop exit
PB: predicated region body
PF: predicated region fallthrough
CT: control target
= control target key end

     0   :  { %s764_s0 = inlined_call_operand.<no memory space> [shape: f32[1], index: 0, kind: input, shape index: {}]   ;;  %s765_s1 = inlined_call_operand.hbm [shape: f32[1,8,256], index: 1, kind: input, shape index: {}]   ;;  %s766_s2 = inlined_call_operand.vmem [shape: f32[1,2,256], index: 2, kind: input, shape index: {}]   ;;  %s767_s3 = inlined_call_operand.hbm [shape: f32[1,8,256], index: 3, kind: output, shape index: {}]  }
   0x1   :  { %8 = sst [smem:[#allocation2]] %s764_s0 }
   0x2   :  { %9 = vsyncpa [#allocation4], 0 }
   0x3   :  { %11 = vsyncpa [#allocation4 + $0x1], 0 }
   0x4   :  { %12 = vsyncpa [#allocation5], 0 }
   0x5   :  { %14 = vsyncpa [#allocation5 + $0x1], 0  ;;  %s587_s14 = smov 0   ;;  %s589_s15 = smov 0  }
   0x6   :  { %s591_s16 = smov 0   ;;  %s593_s17 = smov 0  }
   0x7   :  { %s595_s18 = smov 0   ;;  %s597_s19 = smov 0  }
   0x8 LB: > { %s372_s0 = sadd.s32 4294967295, %s560_s19   ;;  %s373_s20 = sadd.s32 4294967294, %s560_s19   ;;  %s560_s19 = sphi %s597_s19, %s20_s19   ;;  %s556_s18 = sphi %s595_s18, %s783_s18   ;;  %s552_s17 = sphi %s593_s17, %s782_s17   ;;  %s548_s16 = sphi %s591_s16, %s781_s16   ;;  %s544_s15 = sphi %s589_s15, %s780_s15   ;;  %s540_s14 = sphi %s587_s14, %s779_s14  }
   0x9   : > { %s29_s21 = sadd.s32 1, %s556_s18  ;;  %s62_s22 = sadd.s32 1, %s548_s16 }
   0xa   : > { %p30_p0 = scmp.ge.s32.totalorder %s29_s21, 2  ;;  %p69_p1 = scmp.ne.s32.totalorder %s548_s16, %s544_s15 }
   0xb   : > { %p70_p2 = scmp.eq.s32.totalorder %s560_s19, 0  ;;  %p75_p3 = scmp.ne.s32.totalorder %s544_s15, %s540_s14 }
   0xc   : > { %s785_s21 = smov (%p30_p0, %s29_s21), 0  ;;  %p76_p5 = scmp.eq.s32.totalorder %s372_s0, 0 }
   0xd   : > { %p628_p4 = por %p70_p2, %p69_p1  ;;  %s58_s24 = ssub.s32 %s556_s18, %s785_s21 }
   0xe   : > { %p129_p6 = scmp.eq.s32.totalorder %s372_s0, 1  ;;  %p60_p7 = scmp.eq.s32.totalorder %s58_s24, 0 }
   0xf   : > { %p634_p8 = por %p76_p5, %p75_p3  ;;  %p135_p10 = scmp.eq.s32.totalorder %s373_s20, 1 }
  0x10   : > { %p638_p9 = por %p129_p6, %p69_p1  ;;  %p398_p13 = scmp.lt.s32.totalorder %s560_s19, 2 }
  0x11   : > { %s643_s27 = scalar_select %p60_p7, %s548_s16, %s62_s22  }
  0x12   : > { %s771_s26 = scalar_select %p638_p9, 1, 0 }
  0x13   : > { %p645_p11 = por %p135_p10, %p75_p3  ;;  %s158_s29 = sand.u32 1, %s548_s16  }
  0x14   : > { %s376_s30 = sshll.u32 %s158_s29, 3  ;;  %s377_s4 = sshll.u32 %s556_s18, 7 }
  0x15   : > { %s772_s28 = scalar_select %p645_p11, 1, 0 }
  0x16   : > { %s656_s7 = scalar_lea.hbm %s765_s1, %s377_s4  ;;  %s162_s8 = scalar_lea.vmem [#allocation3], %s376_s30 }
  0x17   : > { %s171_s9 = sshll.u32 %s162_s8, 4  ;;  %p662_p0 = pnand %p398_p13, %p628_p4  ;;  %s658_s9 = int_to_ptr.vmem [resolvable:$true] %s171_s9 }
  0x18   : > { %s159_s11 = scalar_lea.sflag [#allocation4], %s158_s29  ;;  %s448_s12 = scalar_lea.hbm %s656_s7, 128 }
  0x19   : > { %p449_p3 = scmp.ne.s32.totalorder %s656_s7, %s448_s12  ;;  %p450_p5 = pneg %p662_p0 }
  0x1a   : > { %s453_s20 = scalar_lea.hbm %s765_s1, 256  ;;  %p454_p4 = scmp.lt.u32.totalorder %s656_s7, %s765_s1 }
  0x1b   : > { %p451_p6 = pnand %p450_p5, %p449_p3  ;;  %p455_p10 = scmp.lt.u32.totalorder %s453_s20, %s448_s12 }
  0x1c   : > { %p457_p12 = scmp.lt.u32.totalorder %s448_s12, %s656_s7 }
  0x1d   : > { %p452_p7 = pneg %p451_p6  ;;  %p456_p13 = por %p455_p10, %p454_p4 }
  0x1f   : > { %p458_p1 = por %p457_p12, %p456_p13 }
  0x21   : > { %p459_p2 = pnand %p458_p1, %p452_p7 }
  0x23   : > { %462 = shalt.err (!%p459_p2)
}
  0x24   : > { %s463_s24 = scalar_lea.vmem %s658_s9, 128  ;;  %s562_s29 = smov [#allocation3]  }
  0x25   : > { %p464_p3 = scmp.ne.s32.totalorder %s658_s9, %s463_s24  ;;  %s468_s30 = sshll.u32 %s562_s29, 4  ;;  %s469_s30 = int_to_ptr.vmem [resolvable:$false] %s468_s30 }
  0x26   : > { %s470_s4 = scalar_lea.vmem %s469_s30, 256  ;;  %p471_p9 = scmp.lt.s32.totalorder %s658_s9, %s469_s30 }
  0x27   : > { %p466_p6 = pnand %p464_p3, %p450_p5  ;;  %p472_p4 = scmp.lt.s32.totalorder %s470_s4, %s463_s24 }
  0x29   : > { %p467_p11 = pneg %p466_p6  ;;  %p473_p10 = por %p472_p4, %p471_p9 }
  0x2b   : > { %p474_p12 = pnand %p473_p10, %p467_p11 }
  0x2d   : > { %477 = shalt.err (!%p474_p12)
}
  0x2e   : > { %393 = dma.hbm_to_vmem [thread:$0]  (!%p662_p0), %s656_s7, 128, %s658_s9, %s159_s11  }
  0x2f   : > { %p774_p1 = scmp.lt.s32.totalorder %s560_s19, 3  ;;  %p775_p2 = scmp.ge.s32.totalorder %s560_s19, 1 }
  0x31   : > { %p188_p5 = pnand %p775_p2, %p774_p1 }
  0x32   : > { %s698_s5 = sand.u32 (!%p188_p5), 1, %s544_s15  }
  0x33   : > { %191 = sbr.rel (%p188_p5) target bundleno = 88 (0x58), region = 32  ;;  %s379_s6 = sshll.u32 (!%p188_p5), %s698_s5, 3 }
  0x34   : > { %s194_s8 = scalar_lea.sflag (!%p188_p5), [#allocation4], %s698_s5  ;;  %s197_s12 = scalar_lea.vmem (!%p188_p5), [#allocation3], %s379_s6 }
  0x3a   : > { %531 = dma.done.wait (%p634_p8), %s194_s8, 128  }
  0x3b   : > { %533 = vsyncadd (%p634_p8), %s194_s8, 4294967168  ;;  %p230_p9 = scmp.lt.s32.totalorder %s552_s17, 1  ;;  %v241_v0 = vlaneseq  ;;  %s236_s7 = sld [smem:[#allocation2]]  ;;  %v237_v7 = vld [vmem:[%s197_s12] sm:$0xf] }
  0x3c   : > { %s227_s25 = scalar_lea.vmem [#allocation6], %s379_s6  ;;  %v247_v10 = vld [vmem:[%s197_s12 + $0x4] sm:$0xf]  ;;  %s383_s22 = sshll.u32 %s552_s17, 7 }
  0x3d   : > { %s231_s9 = scalar_select %p230_p9, %s552_s17, 1  ;;  %v242_v1 = vshrl.u32 %v241_v0, 7 }
  0x3e   : > { %s272_s20 = sshll.u32 %s227_s25, 4  ;;  %s717_s29 = scalar_lea.hbm %s767_s3, %s383_s22  ;;  %s712_s20 = int_to_ptr.vmem [resolvable:$true] %s272_s20 }
  0x3f   : > { %s381_s10 = sshll.u32 %s231_s9, 1  ;;  %v243_v2 = vsub.s32 0, %v242_v1  ;;  %s257_s30 = scalar_lea.sflag [#allocation5], %s698_s5 }
  0x40   : > { %s235_s0 = scalar_lea.vmem %s766_s2, %s381_s10  ;;  %s478_s4 = scalar_lea.vmem %s712_s20, 128 }
  0x41   : > { %v238_v3 = vld [vmem:[%s235_s0] sm:$0x1]  ;;  %v239_v4 = vstv %s236_s7  ;;  %v248_v6 = vld [vmem:[%s235_s0 + $0x1] sm:$0x1]  ;;  %p479_p8 = scmp.ne.s32.totalorder %s712_s20, %s478_s4  ;;  %p776_p11 = scmp.ne.s32.totalorder %s771_s26, 0 }
  0x42   : > { %v240_v5 = vmul.f32 %v239_v4, %v238_v3  ;;  %v249_v8 = vmul.f32 %v248_v6, %v239_v4  ;;  %s563_s17 = smov [#allocation6]  }
  0x43   : > { %p480_p0 = pnand %p479_p8, %p776_p11  ;;  %s482_s6 = sshll.u32 %s563_s17, 4  ;;  %s483_s6 = int_to_ptr.vmem [resolvable:$false] %s482_s6 }
  0x44   : > { %v244_v9 = vrot.slane %v240_v5, %v243_v2  ;;  %v253_v11 = vrot.slane %v249_v8, %v243_v2  ;;  %s484_s8 = scalar_lea.vmem %s483_s6, 256  ;;  %p485_p13 = scmp.lt.s32.totalorder %s712_s20, %s483_s6 }
  0x45   : > { %p481_p7 = pneg %p480_p0  ;;  %p486_p3 = scmp.lt.s32.totalorder %s484_s8, %s478_s4 }
  0x46   : > { %v245_v12 = vadd.f32 %v244_v9, %v237_v7  ;;  %v254_v13 = vadd.f32 %v253_v11, %v247_v10 }
  0x47   : > { %p487_p6 = por %p486_p3, %p485_p13 }
  0x48   : > { %246 = vst [vmem:[%s227_s25] sm:$0xf] %v245_v12  ;;  %255 = vst [vmem:[%s227_s25 + $0x4] sm:$0xf] %v254_v13 }
  0x49   : > { %p488_p4 = pnand %p487_p6, %p481_p7 }
  0x4b   : > { %491 = shalt.err (!%p488_p4)
}
  0x4c   : > { %s492_s5 = scalar_lea.hbm %s717_s29, 128  ;;  %s496_s9 = scalar_lea.hbm %s767_s3, 256 }
  0x4d   : > { %p493_p10 = scmp.ne.s32.totalorder %s717_s29, %s492_s5  ;;  %p497_p2 = scmp.lt.u32.totalorder %s717_s29, %s767_s3 }
  0x4e   : > { %p498_p5 = scmp.lt.u32.totalorder %s496_s9, %s492_s5  ;;  %p500_p8 = scmp.lt.u32.totalorder %s492_s5, %s717_s29 }
  0x4f   : > { %p494_p12 = pnand %p493_p10, %p776_p11 }
  0x50   : > { %p499_p9 = por %p498_p5, %p497_p2 }
  0x51   : > { %p495_p1 = pneg %p494_p12 }
  0x52   : > { %p501_p0 = por %p500_p8, %p499_p9 }
  0x54   : > { %p502_p7 = pnand %p501_p0, %p495_p1 }
  0x56   : > { %505 = shalt.err (!%p502_p7)
}
  0x57   : > { %388 = dma.vmem_to_hbm [thread:$0]  (%p776_p11), %s712_s20, 128, %s717_s29, %s257_s30  }
  0x58 PF: > { %s284_s13 = sand.u32 1, %s540_s14   ;;  %p777_p13 = scmp.ne.s32.totalorder %s772_s28, 0 }
  0x59   : > { %p778_p3 = scmp.ge.s32.totalorder %s560_s19, 2  ;;  %s285_s0 = scalar_lea.sflag [#allocation5], %s284_s13 }
  0x5b   : > { %p395_p6 = pnand %p778_p3, %p777_p13 }
  0x5d   : > { %535 = dma.done.wait (!%p395_p6), %s285_s0, 128  }
  0x5e   : > { %537 = vsyncadd (!%p395_p6), %s285_s0, 4294967168  ;;  %s20_s19 = sadd.s32 1, %s560_s19   ;;  %s779_s14 = smov %s544_s15 }
  0x5f   : > { %p17_p4 = scmp.ge.s32.totalorder %s20_s19, 4   ;;  %s780_s15 = smov %s548_s16 }
  0x60   : > { %s781_s16 = smov %s643_s27  ;;  %s782_s17 = smov %s556_s18 }
  0x61   : > { %s783_s18 = smov %s785_s21  ;;  %19 = sbr.rel (!%p17_p4) target bundleno = 8 (0x8), region = 80 }
  0x68   :  { %290 = vsyncpa [#allocation4], 1 }
  0x69   :  { %292 = vsyncpa [#allocation4 + $0x1], 1 }
  0x6a   :  { %293 = vsyncpa [#allocation5], 1 }
  0x6b   :  { %295 = vsyncpa [#allocation5 + $0x1], 1 }

</bundles_post_ra>
